<compile_context>
chip_gen: v5e
topology: v5e:2x2
jax: 0.10.0
libtpu: 0.0.40
codegen_flags: <defaults>
</compile_context>

<pallas_src>
import functools

import jax
import jax.numpy as jnp
import numpy as np
from jax import lax
from jax.experimental import pallas as pl
from jax.experimental.pallas import tpu as pltpu

_CYCLE_TH = 40.0     # hard-coded threshold in cycle_consistency_loss
_LANE = 128


def _round_up(x, m):
    return -(-x // m) * m


def _recip(x):
    """EUP approximate reciprocal + one Newton step (~f32 exact, no VALU divide)."""
    r = pl.reciprocal(x, approx=True)
    return r * (2.0 - x * r)


def _ctof_kernel(planes_ref, f_ref, out_ref,
                 s_inv_ref, s_im_ref, s_cim_ref,
                 s_invc_ref, s_icm_ref, s_dicm_ref, s_std_ref,
                 *, n_valid, tile_n, masked, shorter_edge, longer_edge,
                 th_epipolar, th_cycle, w_ef, w_cf, w_std, use_std, count):
    step = pl.program_id(0)
    accs = (s_inv_ref, s_im_ref, s_cim_ref, s_invc_ref, s_icm_ref,
            s_dicm_ref, s_std_ref)

    @pl.when(step == 0)
    def _init():
        for r in accs:
            r[...] = jnp.zeros_like(r)

    # ---- stacked planes: leading (untiled) axis indexes the plane ----------
    x1 = planes_ref[0]
    y1 = planes_ref[1]
    x2 = planes_ref[2]
    y2 = planes_ref[3]
    x1e = planes_ref[4]
    y1e = planes_ref[5]
    std2 = planes_ref[6]
    std1 = planes_ref[7]
    f = f_ref[...]                                          # [B, 9]

    # ---- epipolar cost: |coord2_h . (F @ coord1_h)| / ||line[:2]|| ----------
    # 9 broadcast MACs on the VPU (deliberately NOT an MXU contraction).
    l0 = f[:, 0:1] * x1 + f[:, 1:2] * y1 + f[:, 2:3]
    l1 = f[:, 3:4] * x1 + f[:, 4:5] * y1 + f[:, 5:6]
    l2 = f[:, 6:7] * x1 + f[:, 7:8] * y1 + f[:, 8:9]
    # |.| / max(sqrt(l0^2+l1^2), 1e-8)  ==  |.| * min(rsqrt(l0^2+l1^2), 1e8)
    inv_norm = jnp.minimum(lax.rsqrt(l0 * l0 + l1 * l1), 1e8)
    cost = jnp.abs(x2 * l0 + y2 * l1 + l2) * inv_norm       # [B, tile_n]

    mask_e = (cost < shorter_edge * th_epipolar).astype(jnp.float32)
    mask_c = (cost < shorter_edge * th_cycle).astype(jnp.float32)

    # ---- un-normalised inverse-std weights (normalisation folded into finalize)
    if use_std:
        inv2 = _recip(jnp.maximum(std2, 1e-10))
        invc = _recip(jnp.maximum(std2 * std1, 1e-10))
    else:
        inv2 = jnp.ones_like(std2)
        invc = jnp.ones_like(std2)

    if masked:
        # lane-padded block: zero out contributions from lanes >= n_valid
        lane = lax.broadcasted_iota(jnp.int32, std2.shape, 1)
        valid = ((step * tile_n + lane) < n_valid).astype(jnp.float32)
        inv2 = inv2 * valid
        invc = invc * valid
        std2v = std2 * valid
    else:
        std2v = std2

    im = inv2 * mask_e
    icm = invc * mask_c

    # ---- cycle-consistency distance -----------------------------------------
    dx = x1 - x1e
    dy = y1 - y1e
    dist = jnp.sqrt(dx * dx + dy * dy)
    dist = jnp.where(dist < _CYCLE_TH, dist, 0.0)

    # ---- 7 independent one-pass partial sums (associative -> tileable) ------
    s_inv_ref[...] += jnp.sum(inv2, keepdims=True)
    s_im_ref[...] += jnp.sum(im, keepdims=True)
    s_cim_ref[...] += jnp.sum(cost * im, keepdims=True)
    s_invc_ref[...] += jnp.sum(invc, keepdims=True)
    s_icm_ref[...] += jnp.sum(icm, keepdims=True)
    s_dicm_ref[...] += jnp.sum(dist * icm, keepdims=True)
    s_std_ref[...] += jnp.sum(std2v, keepdims=True)

    # ---- finalize: pure scalar math, packed into one lane-dense output row --
    @pl.when(step == pl.num_programs(0) - 1)
    def _finalize():
        s_inv = s_inv_ref[...]
        s_im = s_im_ref[...]
        s_cim = s_cim_ref[...]
        s_invc = s_invc_ref[...]
        s_icm = s_icm_ref[...]
        s_dicm = s_dicm_ref[...]
        s_std = s_std_ref[...]

        eloss = (s_cim / s_inv) / (s_im / s_inv + 1e-8) / longer_edge
        closs = (s_dicm / s_invc) / (s_icm / s_invc + 1e-8) / longer_edge
        std_loss = s_std / count
        loss = w_ef * eloss + w_cf * closs + w_std * std_loss

        lane = lax.broadcasted_iota(jnp.int32, (1, _LANE), 1)
        row = (jnp.where(lane == 0, loss, 0.0)
               + jnp.where(lane == 1, eloss, 0.0)
               + jnp.where(lane == 2, closs, 0.0)
               + jnp.where(lane == 3, std_loss, 0.0))
        out_ref[...] = row


def ctof_criterion_forward(coord1, coord2_ef, coord1_ef, std_2f, std_1f,
                           fmatrix, im_size, *,
                           w_ef=1.0, w_cf=0.1, w_std=0.01,
                           th_epipolar=0.5, th_cycle=0.025, use_std=True,
                           block_n=None):
    """Pallas implementation of CtoFCriterion.forward.

    Returns (loss, eloss_f, closs_f, std_loss) as float32 scalars.
    """
    B, N, _ = coord1.shape
    shorter_edge = float(min(im_size))
    longer_edge = float(max(im_size))

    # TODO(synk): ideally the upstream producer emits this planar [8, B, N]
    # layout directly (zero extra HBM traffic); here a single fused stack
    # replaces the six separately-materialized strided x/y slices of the
    # previous version and feeds the kernel with ONE input DMA.
    planes = jnp.stack(
        [coord1[..., 0], coord1[..., 1],
         coord2_ef[..., 0], coord2_ef[..., 1],
         coord1_ef[..., 0], coord1_ef[..., 1],
         std_2f, std_1f], axis=0).astype(jnp.float32)       # [8, B, N]
    f_flat = fmatrix.reshape(B, 9).astype(jnp.float32)      # [B, 9]

    # ---- tiling policy: full-resident single step for small/medium N,
    #      lane-tiled reduction grid (double-buffered BlockSpec DMA) otherwise.
    if block_n is None:
        block_n = N if N <= 4096 else 512
    if N <= block_n:
        tile_n, grid_n, n_total = N, 1, N
    else:
        tile_n = max(_LANE, _round_up(block_n, _LANE))
        n_total = _round_up(N, tile_n)
        grid_n = n_total // tile_n
    masked = n_total > N
    if masked:
        planes = jnp.pad(planes, ((0, 0), (0, 0), (0, n_total - N)))

    kernel = functools.partial(
        _ctof_kernel,
        n_valid=N, tile_n=tile_n, masked=masked,
        shorter_edge=shorter_edge, longer_edge=longer_edge,
        th_epipolar=float(th_epipolar), th_cycle=float(th_cycle),
        w_ef=float(w_ef), w_cf=float(w_cf), w_std=float(w_std),
        use_std=bool(use_std), count=float(B * N))

    grid_spec = pltpu.PrefetchScalarGridSpec(
        num_scalar_prefetch=0,
        grid=(grid_n,),
        in_specs=[
            pl.BlockSpec((8, B, tile_n), lambda i: (0, 0, i)),
            pl.BlockSpec((B, 9), lambda i: (0, 0)),
        ],
        out_specs=pl.BlockSpec((1, _LANE), lambda i: (0, 0)),
        scratch_shapes=[pltpu.VMEM((1, 1), jnp.float32) for _ in range(7)],
    )

    out_row = pl.pallas_call(
        kernel,
        out_shape=jax.ShapeDtypeStruct((1, _LANE), jnp.float32),
        grid_spec=grid_spec,
        compiler_params=pltpu.CompilerParams(
            dimension_semantics=("arbitrary",)),   # reduction axis
    )(planes, f_flat)

    return out_row[0, 0], out_row[0, 1], out_row[0, 2], out_row[0, 3]


# ---------------- pure-JAX reference (mirrors the PyTorch module) -----------
def _reference(coord1, coord2_ef, coord1_ef, std_2f, std_1f, fmatrix, im_size,
               *, w_ef, w_cf, w_std, th_epipolar, th_cycle, use_std):
    shorter_edge, longer_edge = float(min(im_size)), float(max(im_size))

    def homogenize(c):
        return jnp.concatenate([c, jnp.ones_like(c[..., :1])], axis=-1)

    c1h = jnp.swapaxes(homogenize(coord1), 1, 2)            # [B,3,N]
    c2h = jnp.swapaxes(homogenize(coord2_ef), 1, 2)         # [B,3,N]
    line = jnp.einsum('bij,bjn->bin', fmatrix, c1h)         # [B,3,N]
    nrm = jnp.maximum(jnp.linalg.norm(line[:, :2, :], axis=1, keepdims=True), 1e-8)
    cost = jnp.abs(jnp.sum(c2h * (line / nrm), axis=1))     # [B,N]

    mask_epip = (cost < shorter_edge * th_epipolar).astype(jnp.float32)
    mask_cycle = (cost < shorter_edge * th_cycle).astype(jnp.float32)

    def set_weight(std, mask):
        if use_std:
            inv = 1.0 / jnp.maximum(std, 1e-10)
            w = inv / jnp.mean(inv)
        else:
            w = jnp.ones_like(std)
        w = w * mask
        w = w / (jnp.mean(w) + 1e-8)
        return w

    weight_f = set_weight(std_2f, mask_epip)
    eloss = jnp.mean(cost * weight_f) / longer_edge

    weight_cycle_f = set_weight(std_2f * std_1f, mask_cycle)
    dist = jnp.linalg.norm(coord1 - coord1_ef, axis=-1)
    dist = jnp.where(dist < _CYCLE_TH, dist, 0.0)
    closs = jnp.mean(weight_cycle_f * dist) / longer_edge

    std_loss = jnp.mean(std_2f)
    loss = w_ef * eloss + w_cf * closs + w_std * std_loss
    return loss, eloss, closs, std_loss


def _make_inputs(key, B, N):
    k1, k2, k3, k4, k5, k6 = jax.random.split(key, 6)
    coord1 = jax.random.uniform(k1, (B, N, 2), jnp.float32) * 16.0
    coord2_ef = jax.random.uniform(k2, (B, N, 2), jnp.float32) * 16.0
    coord1_ef = jax.random.uniform(k3, (B, N, 2), jnp.float32) * 16.0
    std_2f = jax.random.uniform(k4, (B, N), jnp.float32, 0.1, 1.0)
    std_1f = jax.random.uniform(k5, (B, N), jnp.float32, 0.1, 1.0)
    fmatrix = jax.random.normal(k6, (B, 3, 3), jnp.float32) * 0.01
    return coord1, coord2_ef, coord1_ef, std_2f, std_1f, fmatrix


if __name__ == "__main__":
    cfg = dict(w_ef=1.0, w_cf=0.1, w_std=0.01,
               th_epipolar=0.5, th_cycle=0.025, use_std=True)
    im_size = (16, 16)
    key = jax.random.PRNGKey(0)
    k_small, k_big = jax.random.split(key)

    # --- small shape: single-step full-resident path -------------------------
    args_small = _make_inputs(k_small, B=2, N=128)
    fwd_small = jax.jit(functools.partial(ctof_criterion_forward,
                                          im_size=im_size, **cfg))
    out_small = jax.block_until_ready(fwd_small(*args_small))
    ref_small = _reference(*args_small, im_size=im_size, **cfg)
    for got, want in zip(out_small, ref_small):
        np.testing.assert_allclose(np.asarray(got), np.asarray(want),
                                   rtol=1e-4, atol=1e-5)

    # --- larger N with a forced small tile: exercises the tiled reduction
    #     grid, the (1,1) scalar accumulators and the lane-padding mask -------
    args_big = _make_inputs(k_big, B=2, N=1000)
    fwd_big = jax.jit(functools.partial(ctof_criterion_forward,
                                        im_size=im_size, block_n=256, **cfg))
    out_big = jax.block_until_ready(fwd_big(*args_big))
    ref_big = _reference(*args_big, im_size=im_size, **cfg)
    for got, want in zip(out_big, ref_big):
        np.testing.assert_allclose(np.asarray(got), np.asarray(want),
                                   rtol=1e-4, atol=1e-5)

    print("KERNEL_OK")
</pallas_src>

<mosaic_0001>
module attributes {stable_mosaic.version = 11 : i64} {
  func.func @_ctof_kernel(%arg0: i32, %arg1: memref<8x2x128xf32, #tpu.memory_space<vmem>>, %arg2: memref<2x9xf32, #tpu.memory_space<vmem>>, %arg3: memref<1x128xf32, #tpu.memory_space<vmem>>, %arg4: memref<1x1xf32, #tpu.memory_space<vmem>>, %arg5: memref<1x1xf32, #tpu.memory_space<vmem>>, %arg6: memref<1x1xf32, #tpu.memory_space<vmem>>, %arg7: memref<1x1xf32, #tpu.memory_space<vmem>>, %arg8: memref<1x1xf32, #tpu.memory_space<vmem>>, %arg9: memref<1x1xf32, #tpu.memory_space<vmem>>, %arg10: memref<1x1xf32, #tpu.memory_space<vmem>>) attributes {dimension_semantics = [#tpu.dimension_semantics<arbitrary>], iteration_bounds = array<i64: 1>, scalar_prefetch = 0 : i64, scratch_operands = 7 : i64, tpu.core_type = #tpu.core_type<tc>, window_params = [{transform_indices = @transform_0, window_bounds = array<i64: 8, 2, 128>}, {pipeline_mode = #tpu.pipeline_mode<synchronous>, transform_indices = @transform_1, window_bounds = array<i64: 2, 9>}, {pipeline_mode = #tpu.pipeline_mode<synchronous>, transform_indices = @transform_2, window_bounds = array<i64: 1, 128>}]} {
    %c0_i32 = arith.constant 0 : i32
    %0 = arith.cmpi eq, %arg0, %c0_i32 : i32
    %1 = arith.extui %0 : i1 to i32
    %c0_i32_0 = arith.constant 0 : i32
    %2 = arith.cmpi ne, %1, %c0_i32_0 : i32
    scf.if %2 {
      %cst_64 = arith.constant 0.000000e+00 : f32
      %158 = vector.broadcast %cst_64 : f32 to vector<1x1xf32>
      %c0_65 = arith.constant 0 : index
      %c0_66 = arith.constant 0 : index
      %159 = vector.load %arg4[%c0_65, %c0_66] : memref<1x1xf32, #tpu.memory_space<vmem>>, vector<1x1xf32>
      tpu.vector_store %arg4[%c0_65, %c0_66], %158 {strides = array<i32>} : memref<1x1xf32, #tpu.memory_space<vmem>>, vector<1x1xf32>,
      %cst_67 = arith.constant 0.000000e+00 : f32
      %160 = vector.broadcast %cst_67 : f32 to vector<1x1xf32>
      %c0_68 = arith.constant 0 : index
      %c0_69 = arith.constant 0 : index
      %161 = vector.load %arg5[%c0_68, %c0_69] : memref<1x1xf32, #tpu.memory_space<vmem>>, vector<1x1xf32>
      tpu.vector_store %arg5[%c0_68, %c0_69], %160 {strides = array<i32>} : memref<1x1xf32, #tpu.memory_space<vmem>>, vector<1x1xf32>,
      %cst_70 = arith.constant 0.000000e+00 : f32
      %162 = vector.broadcast %cst_70 : f32 to vector<1x1xf32>
      %c0_71 = arith.constant 0 : index
      %c0_72 = arith.constant 0 : index
      %163 = vector.load %arg6[%c0_71, %c0_72] : memref<1x1xf32, #tpu.memory_space<vmem>>, vector<1x1xf32>
      tpu.vector_store %arg6[%c0_71, %c0_72], %162 {strides = array<i32>} : memref<1x1xf32, #tpu.memory_space<vmem>>, vector<1x1xf32>,
      %cst_73 = arith.constant 0.000000e+00 : f32
      %164 = vector.broadcast %cst_73 : f32 to vector<1x1xf32>
      %c0_74 = arith.constant 0 : index
      %c0_75 = arith.constant 0 : index
      %165 = vector.load %arg7[%c0_74, %c0_75] : memref<1x1xf32, #tpu.memory_space<vmem>>, vector<1x1xf32>
      tpu.vector_store %arg7[%c0_74, %c0_75], %164 {strides = array<i32>} : memref<1x1xf32, #tpu.memory_space<vmem>>, vector<1x1xf32>,
      %cst_76 = arith.constant 0.000000e+00 : f32
      %166 = vector.broadcast %cst_76 : f32 to vector<1x1xf32>
      %c0_77 = arith.constant 0 : index
      %c0_78 = arith.constant 0 : index
      %167 = vector.load %arg8[%c0_77, %c0_78] : memref<1x1xf32, #tpu.memory_space<vmem>>, vector<1x1xf32>
      tpu.vector_store %arg8[%c0_77, %c0_78], %166 {strides = array<i32>} : memref<1x1xf32, #tpu.memory_space<vmem>>, vector<1x1xf32>,
      %cst_79 = arith.constant 0.000000e+00 : f32
      %168 = vector.broadcast %cst_79 : f32 to vector<1x1xf32>
      %c0_80 = arith.constant 0 : index
      %c0_81 = arith.constant 0 : index
      %169 = vector.load %arg9[%c0_80, %c0_81] : memref<1x1xf32, #tpu.memory_space<vmem>>, vector<1x1xf32>
      tpu.vector_store %arg9[%c0_80, %c0_81], %168 {strides = array<i32>} : memref<1x1xf32, #tpu.memory_space<vmem>>, vector<1x1xf32>,
      %cst_82 = arith.constant 0.000000e+00 : f32
      %170 = vector.broadcast %cst_82 : f32 to vector<1x1xf32>
      %c0_83 = arith.constant 0 : index
      %c0_84 = arith.constant 0 : index
      %171 = vector.load %arg10[%c0_83, %c0_84] : memref<1x1xf32, #tpu.memory_space<vmem>>, vector<1x1xf32>
      tpu.vector_store %arg10[%c0_83, %c0_84], %170 {strides = array<i32>} : memref<1x1xf32, #tpu.memory_space<vmem>>, vector<1x1xf32>,
    } else {
    }
    %c0 = arith.constant 0 : index
    %c0_1 = arith.constant 0 : index
    %c0_2 = arith.constant 0 : index
    %3 = vector.load %arg1[%c0, %c0_1, %c0_2] : memref<8x2x128xf32, #tpu.memory_space<vmem>>, vector<1x2x128xf32>
    %4 = vector.shape_cast %3 : vector<1x2x128xf32> to vector<2x128xf32>
    %c1 = arith.constant 1 : index
    %c0_3 = arith.constant 0 : index
    %c0_4 = arith.constant 0 : index
    %5 = vector.load %arg1[%c1, %c0_3, %c0_4] : memref<8x2x128xf32, #tpu.memory_space<vmem>>, vector<1x2x128xf32>
    %6 = vector.shape_cast %5 : vector<1x2x128xf32> to vector<2x128xf32>
    %c2 = arith.constant 2 : index
    %c0_5 = arith.constant 0 : index
    %c0_6 = arith.constant 0 : index
    %7 = vector.load %arg1[%c2, %c0_5, %c0_6] : memref<8x2x128xf32, #tpu.memory_space<vmem>>, vector<1x2x128xf32>
    %8 = vector.shape_cast %7 : vector<1x2x128xf32> to vector<2x128xf32>
    %c3 = arith.constant 3 : index
    %c0_7 = arith.constant 0 : index
    %c0_8 = arith.constant 0 : index
    %9 = vector.load %arg1[%c3, %c0_7, %c0_8] : memref<8x2x128xf32, #tpu.memory_space<vmem>>, vector<1x2x128xf32>
    %10 = vector.shape_cast %9 : vector<1x2x128xf32> to vector<2x128xf32>
    %c4 = arith.constant 4 : index
    %c0_9 = arith.constant 0 : index
    %c0_10 = arith.constant 0 : index
    %11 = vector.load %arg1[%c4, %c0_9, %c0_10] : memref<8x2x128xf32, #tpu.memory_space<vmem>>, vector<1x2x128xf32>
    %12 = vector.shape_cast %11 : vector<1x2x128xf32> to vector<2x128xf32>
    %c5 = arith.constant 5 : index
    %c0_11 = arith.constant 0 : index
    %c0_12 = arith.constant 0 : index
    %13 = vector.load %arg1[%c5, %c0_11, %c0_12] : memref<8x2x128xf32, #tpu.memory_space<vmem>>, vector<1x2x128xf32>
    %14 = vector.shape_cast %13 : vector<1x2x128xf32> to vector<2x128xf32>
    %c6 = arith.constant 6 : index
    %c0_13 = arith.constant 0 : index
    %c0_14 = arith.constant 0 : index
    %15 = vector.load %arg1[%c6, %c0_13, %c0_14] : memref<8x2x128xf32, #tpu.memory_space<vmem>>, vector<1x2x128xf32>
    %16 = vector.shape_cast %15 : vector<1x2x128xf32> to vector<2x128xf32>
    %c7 = arith.constant 7 : index
    %c0_15 = arith.constant 0 : index
    %c0_16 = arith.constant 0 : index
    %17 = vector.load %arg1[%c7, %c0_15, %c0_16] : memref<8x2x128xf32, #tpu.memory_space<vmem>>, vector<1x2x128xf32>
    %18 = vector.shape_cast %17 : vector<1x2x128xf32> to vector<2x128xf32>
    %c0_17 = arith.constant 0 : index
    %c0_18 = arith.constant 0 : index
    %19 = vector.load %arg2[%c0_17, %c0_18] : memref<2x9xf32, #tpu.memory_space<vmem>>, vector<2x9xf32>
    %20 = vector.extract_strided_slice %19 {offsets = [0, 0], sizes = [2, 1], strides = [1, 1]} : vector<2x9xf32> to vector<2x1xf32>
    %21 = vector.broadcast %20 : vector<2x1xf32> to vector<2x128xf32>
    %22 = arith.mulf %21, %4 : vector<2x128xf32>
    %23 = vector.extract_strided_slice %19 {offsets = [0, 1], sizes = [2, 1], strides = [1, 1]} : vector<2x9xf32> to vector<2x1xf32>
    %24 = vector.broadcast %23 : vector<2x1xf32> to vector<2x128xf32>
    %25 = arith.mulf %24, %6 : vector<2x128xf32>
    %26 = arith.addf %22, %25 : vector<2x128xf32>
    %27 = vector.extract_strided_slice %19 {offsets = [0, 2], sizes = [2, 1], strides = [1, 1]} : vector<2x9xf32> to vector<2x1xf32>
    %28 = vector.broadcast %27 : vector<2x1xf32> to vector<2x128xf32>
    %29 = arith.addf %26, %28 : vector<2x128xf32>
    %30 = vector.extract_strided_slice %19 {offsets = [0, 3], sizes = [2, 1], strides = [1, 1]} : vector<2x9xf32> to vector<2x1xf32>
    %31 = vector.broadcast %30 : vector<2x1xf32> to vector<2x128xf32>
    %32 = arith.mulf %31, %4 : vector<2x128xf32>
    %33 = vector.extract_strided_slice %19 {offsets = [0, 4], sizes = [2, 1], strides = [1, 1]} : vector<2x9xf32> to vector<2x1xf32>
    %34 = vector.broadcast %33 : vector<2x1xf32> to vector<2x128xf32>
    %35 = arith.mulf %34, %6 : vector<2x128xf32>
    %36 = arith.addf %32, %35 : vector<2x128xf32>
    %37 = vector.extract_strided_slice %19 {offsets = [0, 5], sizes = [2, 1], strides = [1, 1]} : vector<2x9xf32> to vector<2x1xf32>
    %38 = vector.broadcast %37 : vector<2x1xf32> to vector<2x128xf32>
    %39 = arith.addf %36, %38 : vector<2x128xf32>
    %40 = vector.extract_strided_slice %19 {offsets = [0, 6], sizes = [2, 1], strides = [1, 1]} : vector<2x9xf32> to vector<2x1xf32>
    %41 = vector.broadcast %40 : vector<2x1xf32> to vector<2x128xf32>
    %42 = arith.mulf %41, %4 : vector<2x128xf32>
    %43 = vector.extract_strided_slice %19 {offsets = [0, 7], sizes = [2, 1], strides = [1, 1]} : vector<2x9xf32> to vector<2x1xf32>
    %44 = vector.broadcast %43 : vector<2x1xf32> to vector<2x128xf32>
    %45 = arith.mulf %44, %6 : vector<2x128xf32>
    %46 = arith.addf %42, %45 : vector<2x128xf32>
    %47 = vector.extract_strided_slice %19 {offsets = [0, 8], sizes = [2, 1], strides = [1, 1]} : vector<2x9xf32> to vector<2x1xf32>
    %48 = vector.broadcast %47 : vector<2x1xf32> to vector<2x128xf32>
    %49 = arith.addf %46, %48 : vector<2x128xf32>
    %50 = arith.mulf %29, %29 : vector<2x128xf32>
    %51 = arith.mulf %39, %39 : vector<2x128xf32>
    %52 = arith.addf %50, %51 : vector<2x128xf32>
    %53 = math.rsqrt %52 : vector<2x128xf32>
    %cst = arith.constant 1.000000e+08 : f32
    %54 = vector.broadcast %cst : f32 to vector<2x128xf32>
    %55 = arith.minimumf %53, %54 : vector<2x128xf32>
    %56 = arith.mulf %8, %29 : vector<2x128xf32>
    %57 = arith.mulf %10, %39 : vector<2x128xf32>
    %58 = arith.addf %56, %57 : vector<2x128xf32>
    %59 = arith.addf %58, %49 : vector<2x128xf32>
    %60 = math.absf %59 : vector<2x128xf32>
    %61 = arith.mulf %60, %55 : vector<2x128xf32>
    %cst_19 = arith.constant 8.000000e+00 : f32
    %62 = vector.broadcast %cst_19 : f32 to vector<2x128xf32>
    %63 = arith.cmpf olt, %61, %62 : vector<2x128xf32>
    %64 = arith.extui %63 : vector<2x128xi1> to vector<2x128xi32>
    %65 = arith.sitofp %64 : vector<2x128xi32> to vector<2x128xf32>
    %cst_20 = arith.constant 4.000000e-01 : f32
    %66 = vector.broadcast %cst_20 : f32 to vector<2x128xf32>
    %67 = arith.cmpf olt, %61, %66 : vector<2x128xf32>
    %68 = arith.extui %67 : vector<2x128xi1> to vector<2x128xi32>
    %69 = arith.sitofp %68 : vector<2x128xi32> to vector<2x128xf32>
    %cst_21 = arith.constant 1.000000e-10 : f32
    %70 = vector.broadcast %cst_21 : f32 to vector<2x128xf32>
    %71 = arith.maximumf %16, %70 : vector<2x128xf32>
    %72 = tpu.reciprocal %71 {approx = true} : vector<2x128xf32> -> vector<2x128xf32>
    %73 = arith.mulf %71, %72 : vector<2x128xf32>
    %cst_22 = arith.constant 2.000000e+00 : f32
    %74 = vector.broadcast %cst_22 : f32 to vector<2x128xf32>
    %75 = arith.subf %74, %73 : vector<2x128xf32>
    %76 = arith.mulf %72, %75 : vector<2x128xf32>
    %77 = arith.mulf %16, %18 : vector<2x128xf32>
    %cst_23 = arith.constant 1.000000e-10 : f32
    %78 = vector.broadcast %cst_23 : f32 to vector<2x128xf32>
    %79 = arith.maximumf %77, %78 : vector<2x128xf32>
    %80 = tpu.reciprocal %79 {approx = true} : vector<2x128xf32> -> vector<2x128xf32>
    %81 = arith.mulf %79, %80 : vector<2x128xf32>
    %cst_24 = arith.constant 2.000000e+00 : f32
    %82 = vector.broadcast %cst_24 : f32 to vector<2x128xf32>
    %83 = arith.subf %82, %81 : vector<2x128xf32>
    %84 = arith.mulf %80, %83 : vector<2x128xf32>
    %85 = arith.mulf %76, %65 : vector<2x128xf32>
    %86 = arith.mulf %84, %69 : vector<2x128xf32>
    %87 = arith.subf %4, %12 : vector<2x128xf32>
    %88 = arith.subf %6, %14 : vector<2x128xf32>
    %89 = arith.mulf %87, %87 : vector<2x128xf32>
    %90 = arith.mulf %88, %88 : vector<2x128xf32>
    %91 = arith.addf %89, %90 : vector<2x128xf32>
    %92 = math.sqrt %91 : vector<2x128xf32>
    %cst_25 = arith.constant 4.000000e+01 : f32
    %93 = vector.broadcast %cst_25 : f32 to vector<2x128xf32>
    %94 = arith.cmpf olt, %92, %93 : vector<2x128xf32>
    %cst_26 = arith.constant 0.000000e+00 : f32
    %95 = vector.broadcast %cst_26 : f32 to vector<2x128xf32>
    %96 = arith.select %94, %92, %95 : vector<2x128xi1>, vector<2x128xf32>
    %c0_27 = arith.constant 0 : index
    %c0_28 = arith.constant 0 : index
    %97 = vector.load %arg4[%c0_27, %c0_28] : memref<1x1xf32, #tpu.memory_space<vmem>>, vector<1x1xf32>
    %98 = vector.shape_cast %76 : vector<2x128xf32> to vector<1x2x128xf32>
    %cst_29 = arith.constant dense<0.000000e+00> : vector<1xf32>
    %99 = vector.multi_reduction <add>, %98, %cst_29 [1, 2] : vector<1x2x128xf32> to vector<1xf32>
    %100 = vector.shape_cast %99 : vector<1xf32> to vector<1x1x1xf32>
    %101 = vector.extract %100[0, 0, 0] : f32 from vector<1x1x1xf32>
    %102 = vector.broadcast %101 : f32 to vector<1x1xf32>
    %103 = arith.addf %97, %102 : vector<1x1xf32>
    %c0_30 = arith.constant 0 : index
    %c0_31 = arith.constant 0 : index
    %104 = vector.load %arg4[%c0_30, %c0_31] : memref<1x1xf32, #tpu.memory_space<vmem>>, vector<1x1xf32>
    tpu.vector_store %arg4[%c0_30, %c0_31], %103 {strides = array<i32>} : memref<1x1xf32, #tpu.memory_space<vmem>>, vector<1x1xf32>,
    %c0_32 = arith.constant 0 : index
    %c0_33 = arith.constant 0 : index
    %105 = vector.load %arg5[%c0_32, %c0_33] : memref<1x1xf32, #tpu.memory_space<vmem>>, vector<1x1xf32>
    %106 = vector.shape_cast %85 : vector<2x128xf32> to vector<1x2x128xf32>
    %cst_34 = arith.constant dense<0.000000e+00> : vector<1xf32>
    %107 = vector.multi_reduction <add>, %106, %cst_34 [1, 2] : vector<1x2x128xf32> to vector<1xf32>
    %108 = vector.shape_cast %107 : vector<1xf32> to vector<1x1x1xf32>
    %109 = vector.extract %108[0, 0, 0] : f32 from vector<1x1x1xf32>
    %110 = vector.broadcast %109 : f32 to vector<1x1xf32>
    %111 = arith.addf %105, %110 : vector<1x1xf32>
    %c0_35 = arith.constant 0 : index
    %c0_36 = arith.constant 0 : index
    %112 = vector.load %arg5[%c0_35, %c0_36] : memref<1x1xf32, #tpu.memory_space<vmem>>, vector<1x1xf32>
    tpu.vector_store %arg5[%c0_35, %c0_36], %111 {strides = array<i32>} : memref<1x1xf32, #tpu.memory_space<vmem>>, vector<1x1xf32>,
    %c0_37 = arith.constant 0 : index
    %c0_38 = arith.constant 0 : index
    %113 = vector.load %arg6[%c0_37, %c0_38] : memref<1x1xf32, #tpu.memory_space<vmem>>, vector<1x1xf32>
    %114 = arith.mulf %61, %85 : vector<2x128xf32>
    %115 = vector.shape_cast %114 : vector<2x128xf32> to vector<1x2x128xf32>
    %cst_39 = arith.constant dense<0.000000e+00> : vector<1xf32>
    %116 = vector.multi_reduction <add>, %115, %cst_39 [1, 2] : vector<1x2x128xf32> to vector<1xf32>
    %117 = vector.shape_cast %116 : vector<1xf32> to vector<1x1x1xf32>
    %118 = vector.extract %117[0, 0, 0] : f32 from vector<1x1x1xf32>
    %119 = vector.broadcast %118 : f32 to vector<1x1xf32>
    %120 = arith.addf %113, %119 : vector<1x1xf32>
    %c0_40 = arith.constant 0 : index
    %c0_41 = arith.constant 0 : index
    %121 = vector.load %arg6[%c0_40, %c0_41] : memref<1x1xf32, #tpu.memory_space<vmem>>, vector<1x1xf32>
    tpu.vector_store %arg6[%c0_40, %c0_41], %120 {strides = array<i32>} : memref<1x1xf32, #tpu.memory_space<vmem>>, vector<1x1xf32>,
    %c0_42 = arith.constant 0 : index
    %c0_43 = arith.constant 0 : index
    %122 = vector.load %arg7[%c0_42, %c0_43] : memref<1x1xf32, #tpu.memory_space<vmem>>, vector<1x1xf32>
    %123 = vector.shape_cast %84 : vector<2x128xf32> to vector<1x2x128xf32>
    %cst_44 = arith.constant dense<0.000000e+00> : vector<1xf32>
    %124 = vector.multi_reduction <add>, %123, %cst_44 [1, 2] : vector<1x2x128xf32> to vector<1xf32>
    %125 = vector.shape_cast %124 : vector<1xf32> to vector<1x1x1xf32>
    %126 = vector.extract %125[0, 0, 0] : f32 from vector<1x1x1xf32>
    %127 = vector.broadcast %126 : f32 to vector<1x1xf32>
    %128 = arith.addf %122, %127 : vector<1x1xf32>
    %c0_45 = arith.constant 0 : index
    %c0_46 = arith.constant 0 : index
    %129 = vector.load %arg7[%c0_45, %c0_46] : memref<1x1xf32, #tpu.memory_space<vmem>>, vector<1x1xf32>
    tpu.vector_store %arg7[%c0_45, %c0_46], %128 {strides = array<i32>} : memref<1x1xf32, #tpu.memory_space<vmem>>, vector<1x1xf32>,
    %c0_47 = arith.constant 0 : index
    %c0_48 = arith.constant 0 : index
    %130 = vector.load %arg8[%c0_47, %c0_48] : memref<1x1xf32, #tpu.memory_space<vmem>>, vector<1x1xf32>
    %131 = vector.shape_cast %86 : vector<2x128xf32> to vector<1x2x128xf32>
    %cst_49 = arith.constant dense<0.000000e+00> : vector<1xf32>
    %132 = vector.multi_reduction <add>, %131, %cst_49 [1, 2] : vector<1x2x128xf32> to vector<1xf32>
    %133 = vector.shape_cast %132 : vector<1xf32> to vector<1x1x1xf32>
    %134 = vector.extract %133[0, 0, 0] : f32 from vector<1x1x1xf32>
    %135 = vector.broadcast %134 : f32 to vector<1x1xf32>
    %136 = arith.addf %130, %135 : vector<1x1xf32>
    %c0_50 = arith.constant 0 : index
    %c0_51 = arith.constant 0 : index
    %137 = vector.load %arg8[%c0_50, %c0_51] : memref<1x1xf32, #tpu.memory_space<vmem>>, vector<1x1xf32>
    tpu.vector_store %arg8[%c0_50, %c0_51], %136 {strides = array<i32>} : memref<1x1xf32, #tpu.memory_space<vmem>>, vector<1x1xf32>,
    %c0_52 = arith.constant 0 : index
    %c0_53 = arith.constant 0 : index
    %138 = vector.load %arg9[%c0_52, %c0_53] : memref<1x1xf32, #tpu.memory_space<vmem>>, vector<1x1xf32>
    %139 = arith.mulf %96, %86 : vector<2x128xf32>
    %140 = vector.shape_cast %139 : vector<2x128xf32> to vector<1x2x128xf32>
    %cst_54 = arith.constant dense<0.000000e+00> : vector<1xf32>
    %141 = vector.multi_reduction <add>, %140, %cst_54 [1, 2] : vector<1x2x128xf32> to vector<1xf32>
    %142 = vector.shape_cast %141 : vector<1xf32> to vector<1x1x1xf32>
    %143 = vector.extract %142[0, 0, 0] : f32 from vector<1x1x1xf32>
    %144 = vector.broadcast %143 : f32 to vector<1x1xf32>
    %145 = arith.addf %138, %144 : vector<1x1xf32>
    %c0_55 = arith.constant 0 : index
    %c0_56 = arith.constant 0 : index
    %146 = vector.load %arg9[%c0_55, %c0_56] : memref<1x1xf32, #tpu.memory_space<vmem>>, vector<1x1xf32>
    tpu.vector_store %arg9[%c0_55, %c0_56], %145 {strides = array<i32>} : memref<1x1xf32, #tpu.memory_space<vmem>>, vector<1x1xf32>,
    %c0_57 = arith.constant 0 : index
    %c0_58 = arith.constant 0 : index
    %147 = vector.load %arg10[%c0_57, %c0_58] : memref<1x1xf32, #tpu.memory_space<vmem>>, vector<1x1xf32>
    %148 = vector.shape_cast %16 : vector<2x128xf32> to vector<1x2x128xf32>
    %cst_59 = arith.constant dense<0.000000e+00> : vector<1xf32>
    %149 = vector.multi_reduction <add>, %148, %cst_59 [1, 2] : vector<1x2x128xf32> to vector<1xf32>
    %150 = vector.shape_cast %149 : vector<1xf32> to vector<1x1x1xf32>
    %151 = vector.extract %150[0, 0, 0] : f32 from vector<1x1x1xf32>
    %152 = vector.broadcast %151 : f32 to vector<1x1xf32>
    %153 = arith.addf %147, %152 : vector<1x1xf32>
    %c0_60 = arith.constant 0 : index
    %c0_61 = arith.constant 0 : index
    %154 = vector.load %arg10[%c0_60, %c0_61] : memref<1x1xf32, #tpu.memory_space<vmem>>, vector<1x1xf32>
    tpu.vector_store %arg10[%c0_60, %c0_61], %153 {strides = array<i32>} : memref<1x1xf32, #tpu.memory_space<vmem>>, vector<1x1xf32>,
    %c0_i32_62 = arith.constant 0 : i32
    %155 = arith.cmpi eq, %arg0, %c0_i32_62 : i32
    %156 = arith.extui %155 : i1 to i32
    %c0_i32_63 = arith.constant 0 : i32
    %157 = arith.cmpi ne, %156, %c0_i32_63 : i32
    scf.if %157 {
      %c0_64 = arith.constant 0 : index
      %c0_65 = arith.constant 0 : index
      %158 = vector.load %arg4[%c0_64, %c0_65] : memref<1x1xf32, #tpu.memory_space<vmem>>, vector<1x1xf32>
      %c0_66 = arith.constant 0 : index
      %c0_67 = arith.constant 0 : index
      %159 = vector.load %arg5[%c0_66, %c0_67] : memref<1x1xf32, #tpu.memory_space<vmem>>, vector<1x1xf32>
      %c0_68 = arith.constant 0 : index
      %c0_69 = arith.constant 0 : index
      %160 = vector.load %arg6[%c0_68, %c0_69] : memref<1x1xf32, #tpu.memory_space<vmem>>, vector<1x1xf32>
      %c0_70 = arith.constant 0 : index
      %c0_71 = arith.constant 0 : index
      %161 = vector.load %arg7[%c0_70, %c0_71] : memref<1x1xf32, #tpu.memory_space<vmem>>, vector<1x1xf32>
      %c0_72 = arith.constant 0 : index
      %c0_73 = arith.constant 0 : index
      %162 = vector.load %arg8[%c0_72, %c0_73] : memref<1x1xf32, #tpu.memory_space<vmem>>, vector<1x1xf32>
      %c0_74 = arith.constant 0 : index
      %c0_75 = arith.constant 0 : index
      %163 = vector.load %arg9[%c0_74, %c0_75] : memref<1x1xf32, #tpu.memory_space<vmem>>, vector<1x1xf32>
      %c0_76 = arith.constant 0 : index
      %c0_77 = arith.constant 0 : index
      %164 = vector.load %arg10[%c0_76, %c0_77] : memref<1x1xf32, #tpu.memory_space<vmem>>, vector<1x1xf32>
      %165 = arith.divf %160, %158 : vector<1x1xf32>
      %166 = arith.divf %159, %158 : vector<1x1xf32>
      %cst_78 = arith.constant 9.99999993E-9 : f32
      %167 = vector.broadcast %cst_78 : f32 to vector<1x1xf32>
      %168 = arith.addf %166, %167 : vector<1x1xf32>
      %169 = arith.divf %165, %168 : vector<1x1xf32>
      %cst_79 = arith.constant 1.600000e+01 : f32
      %170 = vector.broadcast %cst_79 : f32 to vector<1x1xf32>
      %171 = arith.divf %169, %170 : vector<1x1xf32>
      %172 = arith.divf %163, %161 : vector<1x1xf32>
      %173 = arith.divf %162, %161 : vector<1x1xf32>
      %cst_80 = arith.constant 9.99999993E-9 : f32
      %174 = vector.broadcast %cst_80 : f32 to vector<1x1xf32>
      %175 = arith.addf %173, %174 : vector<1x1xf32>
      %176 = arith.divf %172, %175 : vector<1x1xf32>
      %cst_81 = arith.constant 1.600000e+01 : f32
      %177 = vector.broadcast %cst_81 : f32 to vector<1x1xf32>
      %178 = arith.divf %176, %177 : vector<1x1xf32>
      %cst_82 = arith.constant 2.560000e+02 : f32
      %179 = vector.broadcast %cst_82 : f32 to vector<1x1xf32>
      %180 = arith.divf %164, %179 : vector<1x1xf32>
      %cst_83 = arith.constant 1.000000e+00 : f32
      %181 = vector.broadcast %cst_83 : f32 to vector<1x1xf32>
      %182 = arith.mulf %181, %171 : vector<1x1xf32>
      %cst_84 = arith.constant 1.000000e-01 : f32
      %183 = vector.broadcast %cst_84 : f32 to vector<1x1xf32>
      %184 = arith.mulf %183, %178 : vector<1x1xf32>
      %185 = arith.addf %182, %184 : vector<1x1xf32>
      %cst_85 = arith.constant 0.00999999977 : f32
      %186 = vector.broadcast %cst_85 : f32 to vector<1x1xf32>
      %187 = arith.mulf %186, %180 : vector<1x1xf32>
      %188 = arith.addf %185, %187 : vector<1x1xf32>
      %189 = tpu.iota {dimensions = array<i32: 1>} : vector<1x128xi32>
      %c0_i32_86 = arith.constant 0 : i32
      %190 = vector.broadcast %c0_i32_86 : i32 to vector<1x128xi32>
      %191 = arith.cmpi eq, %189, %190 : vector<1x128xi32>
      %cst_87 = arith.constant 0.000000e+00 : f32
      %192 = vector.shape_cast %188 : vector<1x1xf32> to vector<1x1xf32>
      %193 = vector.broadcast %192 : vector<1x1xf32> to vector<1x128xf32>
      %194 = vector.broadcast %cst_87 : f32 to vector<1x128xf32>
      %195 = arith.select %191, %193, %194 : vector<1x128xi1>, vector<1x128xf32>
      %c1_i32 = arith.constant 1 : i32
      %196 = vector.broadcast %c1_i32 : i32 to vector<1x128xi32>
      %197 = arith.cmpi eq, %189, %196 : vector<1x128xi32>
      %cst_88 = arith.constant 0.000000e+00 : f32
      %198 = vector.shape_cast %171 : vector<1x1xf32> to vector<1x1xf32>
      %199 = vector.broadcast %198 : vector<1x1xf32> to vector<1x128xf32>
      %200 = vector.broadcast %cst_88 : f32 to vector<1x128xf32>
      %201 = arith.select %197, %199, %200 : vector<1x128xi1>, vector<1x128xf32>
      %202 = arith.addf %195, %201 : vector<1x128xf32>
      %c2_i32 = arith.constant 2 : i32
      %203 = vector.broadcast %c2_i32 : i32 to vector<1x128xi32>
      %204 = arith.cmpi eq, %189, %203 : vector<1x128xi32>
      %cst_89 = arith.constant 0.000000e+00 : f32
      %205 = vector.shape_cast %178 : vector<1x1xf32> to vector<1x1xf32>
      %206 = vector.broadcast %205 : vector<1x1xf32> to vector<1x128xf32>
      %207 = vector.broadcast %cst_89 : f32 to vector<1x128xf32>
      %208 = arith.select %204, %206, %207 : vector<1x128xi1>, vector<1x128xf32>
      %209 = arith.addf %202, %208 : vector<1x128xf32>
      %c3_i32 = arith.constant 3 : i32
      %210 = vector.broadcast %c3_i32 : i32 to vector<1x128xi32>
      %211 = arith.cmpi eq, %189, %210 : vector<1x128xi32>
      %cst_90 = arith.constant 0.000000e+00 : f32
      %212 = vector.shape_cast %180 : vector<1x1xf32> to vector<1x1xf32>
      %213 = vector.broadcast %212 : vector<1x1xf32> to vector<1x128xf32>
      %214 = vector.broadcast %cst_90 : f32 to vector<1x128xf32>
      %215 = arith.select %211, %213, %214 : vector<1x128xi1>, vector<1x128xf32>
      %216 = arith.addf %209, %215 : vector<1x128xf32>
      %c0_91 = arith.constant 0 : index
      %c0_92 = arith.constant 0 : index
      %217 = vector.load %arg3[%c0_91, %c0_92] : memref<1x128xf32, #tpu.memory_space<vmem>>, vector<1x128xf32>
      tpu.vector_store %arg3[%c0_91, %c0_92], %216 {strides = array<i32>} : memref<1x128xf32, #tpu.memory_space<vmem>>, vector<1x128xf32>,
    } else {
    }
    return
  }
  func.func @transform_0(%arg0: i32) -> (i32, i32, i32) {
    %c0_i32 = arith.constant 0 : i32
    %c0_i32_0 = arith.constant 0 : i32
    %c0_i32_1 = arith.constant 0 : i32
    return %c0_i32, %c0_i32_0, %arg0 : i32, i32, i32
  }
  func.func @transform_1(%arg0: i32) -> (i32, i32) {
    %c0_i32 = arith.constant 0 : i32
    %c0_i32_0 = arith.constant 0 : i32
    %c0_i32_1 = arith.constant 0 : i32
    return %c0_i32, %c0_i32_0 : i32, i32
  }
  func.func @transform_2(%arg0: i32) -> (i32, i32) {
    %c0_i32 = arith.constant 0 : i32
    %c0_i32_0 = arith.constant 0 : i32
    %c0_i32_1 = arith.constant 0 : i32
    return %c0_i32, %c0_i32_0 : i32, i32
  }
}

</mosaic_0001>

<bundles_post_ra>
// kernel: ctof_criterion_forward.1
= control target key start
LH: loop header
LB: loop body
LE: loop exit
PB: predicated region body
PF: predicated region fallthrough
CT: control target
= control target key end

     0   :  { %v452_v0 = vmov 3   ;;  %v453_v1 = vmov 0   ;;  %v454_v3 = vmov 2   ;;  %v455_v4 = vmov 4   ;;  %s549_s1 = inlined_call_operand.vmem [shape: f32[2,9], index: 1, kind: input, shape index: {}]   ;;  %s550_s0 = inlined_call_operand.vmem [shape: f32[8,2,128], index: 0, kind: input, shape index: {}]   ;;  %s551_s2 = inlined_call_operand.vmem [shape: f32[1,128], index: 2, kind: output, shape index: {}]  }
   0x1   :  { %422 = vset.pattern.permute.xlu1 %v452_v0  ;;  %420 = vset.pattern.permute.xlu0 %v453_v1  ;;  %v38_v2 = vld [vmem:[%s549_s1] sm:$0x3]  ;;  %v456_v5 = vmov 1   ;;  %v457_v6 = vmov 5   ;;  %v458_v7 = vmov 6   ;;  %v459_v8 = vmov 8  }
   0x2   :  { %57 = vperm.xlu1 %422, %v38_v2   ;;  %41 = vperm.xlu0 %420, %v38_v2   ;;  %v460_v9 = vmov 7   ;;  %v485_v10 = vld [vmem:[%s550_s0 + $0xc] sm:$0x3]  ;;  %vm147_vm0 = vcmask 1041408   ;;  %v388_v16 = vld [vmem:[%s550_s0 + $0x8] sm:$0x3] }
   0x3   :  { %424 = vset.pattern.permute.xlu2 %v454_v3  ;;  %v114_v11 = vmax.f32 %v485_v10, 1e-10  ;;  %v389_v17 = vld [vmem:[%s550_s0 + $0xa] sm:$0x3]  ;;  %v23_v20 = vld [vmem:[%s550_s0] sm:$0x3] }
   0x4   :  { %52 = vperm.xlu2 %424, %v38_v2   ;;  %v385_v21 = vld [vmem:[%s550_s0 + $0x2] sm:$0x3]  ;;  %v127_v23 = vsub.f32 %v23_v20, %v388_v16  ;;  %v391_v38 = vld [vmem:[%s550_s0 + $0xe] sm:$0x3]  ;;  %v387_v52 = vld [vmem:[%s550_s0 + $0x6] sm:$0x3] }
   0x5   :  { %432 = vrcp.f32 %v114_v11  ;;  %v128_v25 = vsub.f32 %v385_v21, %v389_v17  ;;  %v119_v41 = vmul.f32 %v391_v38, %v485_v10  ;;  %v386_v53 = vld [vmem:[%s550_s0 + $0x4] sm:$0x3]  ;;  %vm15_vm9 = vcmask 0  }
   0x6   :  { %v129_v26 = vmul.f32 %v127_v23, %v127_v23 }
   0x7   :  { %v130_v27 = vmul.f32 %v128_v25, %v128_v25  ;;  %v120_v48 = vmax.f32 %v119_v41, 1e-10 }
   0x9   :  { %v504_v28 = vadd.f32 %v130_v27, %v129_v26 }
   0xa   :  { %423 = vset.pattern.permute.xlu1 %v455_v4  ;;  %421 = vset.pattern.permute.xlu0 %v456_v5 }
   0xb   :  { %62 = vperm.xlu1 %423, %v38_v2   ;;  %46 = vperm.xlu0 %421, %v38_v2   ;;  %v433_v12 = vpop.eup %432  ;;  %434 = vrsqrt.f32 %v504_v28  ;;  %vm139_vm6 = vcmp.eq.f32.partialorder %v504_v28, inf  ;;  %vm141_vm7 = vcmp.eq.f32.partialorder %v504_v28, 0.0 }
   0xc   :  { %425 = vset.pattern.permute.xlu2 %v457_v6  ;;  %v116_v13 = vmul.f32 %v433_v12, %v114_v11 }
   0xd   :  { %68 = vperm.xlu2 %425, %v38_v2  }
   0xe   :  { %v117_v14 = vsub.f32 2.0, %v116_v13 }
  0x10   :  { %v488_v15 = vmul.f32 %v433_v12, %v117_v14 }
  0x11   :  { %v435_v44 = vpop.eup %434 }
  0x12   :  { %v148_v18 = vsel %vm147_vm0, %v488_v15, 0.0  ;;  %v133_v49 = vmul.f32 %v435_v44, %v504_v28 }
  0x13   :  { %426 = vset.pattern.permute.xlu1 %v458_v7  ;;  %428 = vset.pattern.permute.xlu0 %v459_v8 }
  0x14   :  { %73 = vperm.xlu1 %426, %v38_v2   ;;  %84 = vperm.xlu0 %428, %v38_v2   ;;  %v134_v54 = vmul.f32 %v435_v44, %v133_v49 }
  0x15   :  { %427 = vset.pattern.permute.xlu2 %v460_v9 }
  0x16   :  { %78 = vperm.xlu2 %427, %v38_v2   ;;  %v135_v63 = vmul.f32 0.5, %v134_v54 }
  0x18   :  { %v136_v5 = vsub.f32 1.5, %v135_v63 }
  0x1a   :  { %v137_v11 = vmul.f32 %v435_v44, %v136_v5 }
  0x1c   :  { %430 = vset.pattern.permute.xlu0 %v453_v1  ;;  %431 = vset.pattern.permute.xlu1 %v453_v1  ;;  %v138_v17 = vmul.f32 %v137_v11, %v504_v28 }
  0x1e   :  { %429 = vset.pattern.permute.xlu2 %v453_v1  ;;  %v140_v23 = vsel %vm139_vm6, %v504_v28, %v138_v17 }
  0x3e   :  { %149 = vadd.xlane.f32.xlu1 %v148_v18  ;;  %v461_v18 = vmov 0.0  }
  0x3f   :  { %16 = vst.msk [vmem:[#allocation2] sm:$0x1] %vm15_vm9, %v461_v18 }
  0x40   :  { %17 = vst.msk [vmem:[#allocation3] sm:$0x1] %vm15_vm9, %v461_v18 }
  0x41   :  { %18 = vst.msk [vmem:[#allocation4] sm:$0x1] %vm15_vm9, %v461_v18 }
  0x42   :  { %19 = vst.msk [vmem:[#allocation5] sm:$0x1] %vm15_vm9, %v461_v18 }
  0x43   :  { %20 = vst.msk [vmem:[#allocation6] sm:$0x1] %vm15_vm9, %v461_v18 }
  0x44   :  { %21 = vst.msk [vmem:[#allocation7] sm:$0x1] %vm15_vm9, %v461_v18 }
  0x45   :  { %22 = vst.msk [vmem:[#allocation8] sm:$0x1] %vm15_vm9, %v461_v18 }
  0x5e   :  { %v53_v19 = vpop.permute.xlu2 %52 }
  0x67   :  { %v69_v29 = vpop.permute.xlu2 %68 }
  0x70   :  { %v79_v46 = vpop.permute.xlu2 %78 }
  0x71   :  { %v81_v50 = vmul.f32 %v385_v21, %v79_v46 }
  0x74   :  { %v58_v22 = vpop.permute.xlu1 %57  ;;  %v42_v24 = vpop.permute.xlu0 %41 }
  0x75   :  { %v60_v32 = vmul.f32 %v58_v22, %v23_v20  ;;  %v44_v33 = vmul.f32 %v42_v24, %v23_v20  ;;  %v142_v24 = vand.u32 2147483648, %v504_v28 }
  0x7d   :  { %v63_v30 = vpop.permute.xlu1 %62  ;;  %v47_v31 = vpop.permute.xlu0 %46 }
  0x7e   :  { %v65_v34 = vmul.f32 %v385_v21, %v63_v30  ;;  %v49_v35 = vmul.f32 %v385_v21, %v47_v31  ;;  %v143_v30 = vsel %vm141_vm7, %v142_v24, %v140_v23 }
  0x7f   :  { %vm144_vm8 = vcmp.lt.f32.partialorder %v143_v30, 40.0 }
  0x80   :  { %v50_v36 = vadd.f32 %v49_v35, %v44_v33  ;;  %v66_v37 = vadd.f32 %v65_v34, %v60_v32  ;;  %v145_v32 = vsel %vm144_vm8, %v143_v30, 0.0 }
  0x82   :  { %v55_v39 = vadd.f32 %v53_v19, %v50_v36  ;;  %v71_v40 = vadd.f32 %v69_v29, %v66_v37 }
  0x84   :  { %v88_v42 = vmul.f32 %v55_v39, %v55_v39  ;;  %v89_v43 = vmul.f32 %v71_v40, %v71_v40  ;;  %v103_v59 = vmul.f32 %v387_v52, %v71_v40  ;;  %v102_v60 = vmul.f32 %v386_v53, %v55_v39 }
  0x86   :  { %v90_v45 = vadd.f32 %v89_v43, %v88_v42  ;;  %v74_v47 = vpop.permute.xlu1 %73  ;;  %v85_v58 = vpop.permute.xlu0 %84  ;;  %v104_v2 = vadd.f32 %v103_v59, %v102_v60 }
  0x87   :  { %v76_v51 = vmul.f32 %v74_v47, %v23_v20 }
  0x88   :  { %436 = vrsqrt.f32 %v90_v45  ;;  %vm97_vm2 = vweird.f32 %v90_v45 }
  0x89   :  { %438 = vrcp.f32 %v120_v48  ;;  %v82_v56 = vadd.f32 %v81_v50, %v76_v51 }
  0x8b   :  { %v87_v0 = vadd.f32 %v85_v58, %v82_v56 }
  0x8d   :  { %v105_v6 = vadd.f32 %v104_v2, %v87_v0 }
  0x8e   :  { %v437_v55 = vpop.eup %436 }
  0x8f   :  { %v92_v57 = vmul.f32 %v437_v55, %v90_v45  ;;  %v439_v61 = vpop.eup %438  ;;  %vm98_vm1 = vweird.f32 %v437_v55  ;;  %v106_v13 = vand.u32 2147483647, %v105_v6 }
  0x90   :  { %v122_v3 = vmul.f32 %v439_v61, %v120_v48  ;;  %vm99_vm3 = vmor %vm97_vm2, %vm98_vm1 }
  0x91   :  { %v93_v62 = vmul.f32 %v437_v55, %v92_v57 }
  0x92   :  { %v123_v8 = vsub.f32 2.0, %v122_v3 }
  0x93   :  { %v94_v1 = vmul.f32 0.5, %v93_v62  ;;  %v146_v62 = vld [vmem:[#allocation2] sm:$0x1] }
  0x94   :  { %v124_v16 = vmul.f32 %v439_v61, %v123_v8 }
  0x95   :  { %v95_v4 = vsub.f32 1.5, %v94_v1 }
  0x96   :  { %v192_v31 = vsel %vm147_vm0, %v124_v16, 0.0 }
  0x97   :  { %v96_v7 = vmul.f32 %v437_v55, %v95_v4 }
  0x99   :  { %v100_v9 = vsel %vm99_vm3, %v437_v55, %v96_v7 }
  0x9a   :  { %v101_v12 = vmin.f32 %v100_v9, 1e+08 }
  0x9c   :  { %v107_v14 = vmul.f32 %v106_v13, %v101_v12 }
  0x9e   :  { %vm111_vm4 = vcmp.lt.f32.partialorder %v107_v14, 0.4  ;;  %vm108_vm5 = vcmp.lt.f32.partialorder %v107_v14, 8.0 }
  0x9f   :  { %v393_v19 = vsel %vm111_vm4, 1.0, %v461_v18  ;;  %v392_v20 = vsel %vm108_vm5, 1.0, %v461_v18 }
  0xa0   :  { %v126_v21 = vmul.f32 %v393_v19, %v124_v16  ;;  %v125_v22 = vmul.f32 %v392_v20, %v488_v15  ;;  %v235_v15 = vsel %vm147_vm0, %v485_v10, 0.0 }
  0xa2   :  { %v206_v25 = vsel %vm147_vm0, %v126_v21, 0.0  ;;  %v163_v26 = vsel %vm147_vm0, %v125_v22, 0.0  ;;  %v177_v27 = vmul.f32 %v125_v22, %v107_v14  ;;  %v220_v33 = vmul.f32 %v145_v32, %v126_v21 }
  0xa3   :  { %207 = vadd.xlane.f32.xlu1 %v206_v25  ;;  %164 = vadd.xlane.f32.xlu2 %v163_v26 }
  0xa4   :  { %v178_v29 = vsel %vm147_vm0, %v177_v27, 0.0  ;;  %v221_v34 = vsel %vm147_vm0, %v220_v33, 0.0 }
  0xa5   :  { %179 = vadd.xlane.f32.xlu0 %v178_v29  ;;  %v162_v29 = vld [vmem:[#allocation3] sm:$0x1] }
  0xab   :  { %193 = vadd.xlane.f32.xlu2 %v192_v31  ;;  %236 = vadd.xlane.f32.xlu1 %v235_v15  ;;  %v176_v31 = vld [vmem:[#allocation4] sm:$0x1] }
  0xb1   :  { %v150_v28 = vpop.xlane.xlu1 %149 }
  0xb2   :  { %v151_v35 = vrot.slane %v150_v28, 4 }
  0xb3   :  { %222 = vadd.xlane.f32.xlu2 %v221_v34 }
  0xb4   :  { %v152_v36 = vadd.f32 %v151_v35, %v150_v28 }
  0xb6   :  { %v153_v37 = vrot.slane %v152_v36, 2 }
  0xb8   :  { %v154_v38 = vadd.f32 %v153_v37, %v152_v36 }
  0xba   :  { %v155_v39 = vrot.slane %v154_v38, 1 }
  0xbc   :  { %v156_v40 = vadd.f32 %v155_v39, %v154_v38  ;;  %v191_v38 = vld [vmem:[#allocation5] sm:$0x1]  ;;  %v462_v39 = vmov 16.0  }
  0xbe   :  { %394 = vpush %v156_v40  ;;  %v205_v40 = vld [vmem:[#allocation6] sm:$0x1] }
  0xef   :  { %s395_s0 = spop %394 }
  0xf0   :  { %v158_v1 = vstv %s395_s0 }
  0xf1   :  { %v159_v4 = vadd.f32 %v158_v1, %v146_v62 }
  0xf3   :  { %161 = vst.msk [vmem:[#allocation2] sm:$0x1] %vm15_vm9, %v159_v4 }
  0xfa   :  { %v251_v23 = vld [vmem:[#allocation2] sm:$0x1] }
  0xfb   :  { %440 = vrcp.f32 %v251_v23  ;;  %vm263_vm10 = vweird.f32 %v251_v23  ;;  %v269_v15 = vand.u32 2147483648, %v251_v23  ;;  %v267_v34 = vand.u32 2147483647, %v251_v23 }
  0xfc   :  { %442 = vrcp.f32 %v462_v39 }
  0xfd   :  { %v270_v36 = vor.u32 1.1754944e-38, %v269_v15  ;;  %vm268_vm13 = vcmp.eq.f32.partialorder %v267_v34, 8.507059e+37 }
 0x101   :  { %v441_v24 = vpop.eup %440 }
 0x102   :  { %v259_v25 = vmul.f32 %v441_v24, %v251_v23  ;;  %vm264_vm11 = vweird.f32 %v441_v24 }
 0x103   :  { %vm265_vm12 = vmor %vm263_vm10, %vm264_vm11 }
 0x104   :  { %v260_v26 = vsub.f32 1.0, %v259_v25 }
 0x106   :  { %v261_v27 = vmul.f32 %v441_v24, %v260_v26 }
 0x108   :  { %v262_v33 = vadd.f32 %v441_v24, %v261_v27 }
 0x10a   :  { %v266_v37 = vsel %vm265_vm12, %v441_v24, %v262_v33 }
 0x116   :  { %v208_v10 = vpop.xlane.xlu1 %207  ;;  %v165_v41 = vpop.xlane.xlu2 %164 }
 0x117   :  { %v209_v42 = vrot.slane %v208_v10, 4  ;;  %v166_v43 = vrot.slane %v165_v41, 4 }
 0x118   :  { %v180_v44 = vpop.xlane.xlu0 %179 }
 0x119   :  { %v167_v45 = vadd.f32 %v166_v43, %v165_v41  ;;  %v181_v46 = vrot.slane %v180_v44, 4  ;;  %v210_v47 = vadd.f32 %v209_v42, %v208_v10  ;;  %v271_v41 = vsel %vm268_vm13, %v270_v36, %v266_v37 }
 0x11b   :  { %v168_v48 = vrot.slane %v167_v45, 2  ;;  %v182_v49 = vadd.f32 %v181_v46, %v180_v44  ;;  %v211_v52 = vrot.slane %v210_v47, 2 }
 0x11d   :  { %v183_v50 = vrot.slane %v182_v49, 2  ;;  %v169_v51 = vadd.f32 %v168_v48, %v167_v45  ;;  %v212_v61 = vadd.f32 %v211_v52, %v210_v47  ;;  %v443_v47 = vpop.eup %442 }
 0x11e   :  { %v194_v53 = vpop.xlane.xlu2 %193  ;;  %v237_v60 = vpop.xlane.xlu1 %236  ;;  %vm295_vm15 = vweird.f32 %v443_v47 }
 0x11f   :  { %v195_v54 = vrot.slane %v194_v53, 4  ;;  %v170_v55 = vrot.slane %v169_v51, 1  ;;  %v184_v56 = vadd.f32 %v183_v50, %v182_v49  ;;  %v238_v2 = vrot.slane %v237_v60, 4  ;;  %v219_v49 = vld [vmem:[#allocation7] sm:$0x1] }
 0x120   :  { %v213_v6 = vrot.slane %v212_v61, 1  ;;  %v291_v50 = vmul.f32 16.0, %v443_v47 }
 0x121   :  { %v196_v57 = vadd.f32 %v195_v54, %v194_v53  ;;  %v171_v58 = vadd.f32 %v170_v55, %v169_v51  ;;  %v185_v59 = vrot.slane %v184_v56, 1  ;;  %v239_v9 = vadd.f32 %v238_v2, %v237_v60  ;;  %v234_v53 = vld [vmem:[#allocation8] sm:$0x1] }
 0x122   :  { %v214_v13 = vadd.f32 %v213_v6, %v212_v61  ;;  %v292_v55 = vsub.f32 1.0, %v291_v50 }
 0x123   :  { %v197_v63 = vrot.slane %v196_v57, 2  ;;  %396 = vpush %v171_v58  ;;  %v186_v0 = vadd.f32 %v185_v59, %v184_v56  ;;  %v240_v16 = vrot.slane %v239_v9, 2 }
 0x124   :  { %v293_v60 = vmul.f32 %v443_v47, %v292_v55 }
 0x125   :  { %398 = vpush %v186_v0  ;;  %v198_v3 = vadd.f32 %v197_v63, %v196_v57  ;;  %v241_v19 = vadd.f32 %v240_v16, %v239_v9 }
 0x126   :  { %v223_v5 = vpop.xlane.xlu2 %222  ;;  %v294_v4 = vadd.f32 %v443_v47, %v293_v60 }
 0x127   :  { %v224_v7 = vrot.slane %v223_v5, 4  ;;  %v199_v8 = vrot.slane %v198_v3, 1  ;;  %v242_v21 = vrot.slane %v241_v19, 1 }
 0x129   :  { %v225_v11 = vadd.f32 %v224_v7, %v223_v5  ;;  %v200_v12 = vadd.f32 %v199_v8, %v198_v3  ;;  %v243_v22 = vadd.f32 %v242_v21, %v241_v19 }
 0x12b   :  { %v226_v14 = vrot.slane %v225_v11, 2  ;;  %400 = vpush %v200_v12 }
 0x12c   :  { %402 = vpush %v214_v13 }
 0x12d   :  { %v227_v17 = vadd.f32 %v226_v14, %v225_v11  ;;  %v463_v11 = vmov 256.0  }
 0x12f   :  { %v228_v18 = vrot.slane %v227_v17, 1 }
 0x131   :  { %v229_v20 = vadd.f32 %v228_v18, %v227_v17  ;;  %v296_v17 = vsel %vm295_vm15, %v443_v47, %v294_v4 }
 0x133   :  { %404 = vpush %v229_v20 }
 0x134   :  { %406 = vpush %v243_v22 }
 0x154   :  { %s397_s26 = spop %396 }
 0x155   :  { %v173_v30 = vstv %s397_s26 }
 0x156   :  { %v174_v32 = vadd.f32 %v173_v30, %v162_v29  ;;  %s399_s27 = spop %398 }
 0x157   :  { %v188_v28 = vstv %s399_s27 }
 0x158   :  { %175 = vst.msk [vmem:[#allocation3] sm:$0x1] %vm15_vm9, %v174_v32  ;;  %v189_v35 = vadd.f32 %v188_v28, %v176_v31 }
 0x15a   :  { %190 = vst.msk [vmem:[#allocation4] sm:$0x1] %vm15_vm9, %v189_v35 }
 0x15c   :  { %s401_s28 = spop %400 }
 0x15d   :  { %v202_v10 = vstv %s401_s28  ;;  %s403_s29 = spop %402 }
 0x15e   :  { %v203_v42 = vadd.f32 %v202_v10, %v191_v38  ;;  %v216_v43 = vstv %s403_s29 }
 0x15f   :  { %v217_v44 = vadd.f32 %v216_v43, %v205_v40  ;;  %v252_v45 = vld [vmem:[#allocation3] sm:$0x1] }
 0x160   :  { %204 = vst.msk [vmem:[#allocation5] sm:$0x1] %vm15_vm9, %v203_v42  ;;  %v273_v46 = vmul.f32 %v271_v41, %v252_v45 }
 0x161   :  { %218 = vst.msk [vmem:[#allocation6] sm:$0x1] %vm15_vm9, %v217_v44  ;;  %v253_v63 = vld [vmem:[#allocation4] sm:$0x1] }
 0x162   :  { %v274_v48 = vadd.f32 1e-08, %v273_v46  ;;  %v272_v5 = vmul.f32 %v271_v41, %v253_v63 }
 0x164   :  { %s405_s30 = spop %404  ;;  %444 = vrcp.f32 %v274_v48  ;;  %v284_v0 = vand.u32 2147483647, %v274_v48  ;;  %v286_v1 = vand.u32 2147483648, %v274_v48  ;;  %vm280_vm0 = vweird.f32 %v274_v48 }
 0x165   :  { %v231_v51 = vstv %s405_s30  ;;  %s407_s3 = spop %406 }
 0x166   :  { %v232_v52 = vadd.f32 %v231_v51, %v219_v49  ;;  %v245_v56 = vstv %s407_s3  ;;  %vm285_vm2 = vcmp.eq.f32.partialorder %v284_v0, 8.507059e+37  ;;  %v287_v8 = vor.u32 1.1754944e-38, %v286_v1 }
 0x167   :  { %v254_v54 = vld [vmem:[#allocation5] sm:$0x1]  ;;  %v246_v57 = vadd.f32 %v245_v56, %v234_v53 }
 0x168   :  { %233 = vst.msk [vmem:[#allocation7] sm:$0x1] %vm15_vm9, %v232_v52  ;;  %446 = vrcp.f32 %v254_v54  ;;  %v309_v9 = vand.u32 2147483648, %v254_v54  ;;  %v307_v14 = vand.u32 2147483647, %v254_v54  ;;  %vm303_vm4 = vweird.f32 %v254_v54 }
 0x169   :  { %247 = vst.msk [vmem:[#allocation8] sm:$0x1] %vm15_vm9, %v246_v57  ;;  %448 = vrcp.f32 %v463_v11  ;;  %v255_v24 = vld [vmem:[#allocation6] sm:$0x1]  ;;  %v343_v52 = vlaneseq }
 0x16a   :  { %v445_v58 = vpop.eup %444  ;;  %v310_v20 = vor.u32 1.1754944e-38, %v309_v9  ;;  %vm308_vm6 = vcmp.eq.f32.partialorder %v307_v14, 8.507059e+37 }
 0x16b   :  { %v276_v59 = vmul.f32 %v445_v58, %v274_v48  ;;  %vm281_vm14 = vweird.f32 %v445_v58  ;;  %v344_v53 = vand.u32 127, %v343_v52 }
 0x16c   :  { %vm282_vm1 = vmor %vm280_vm0, %vm281_vm14 }
 0x16d   :  { %v277_v61 = vsub.f32 1.0, %v276_v59  ;;  %vm345_vm12 = vcmp.eq.s32.totalorder %v344_v53, 0  ;;  %vm353_vm13 = vcmp.eq.s32.totalorder %v344_v53, 1  ;;  %vm362_vm14 = vcmp.eq.s32.totalorder %v344_v53, 2 }
 0x16e   :  { %v447_v62 = vpop.eup %446  ;;  %vm371_vm15 = vcmp.eq.s32.totalorder %v344_v53, 3 }
 0x16f   :  { %v278_v2 = vmul.f32 %v445_v58, %v277_v61  ;;  %v299_v3 = vmul.f32 %v447_v62, %v254_v54  ;;  %vm304_vm3 = vweird.f32 %v447_v62  ;;  %v449_v23 = vpop.eup %448  ;;  %v256_v38 = vld [vmem:[#allocation7] sm:$0x1] }
 0x170   :  { %vm305_vm5 = vmor %vm303_vm4, %vm304_vm3  ;;  %v332_v29 = vmul.f32 256.0, %v449_v23  ;;  %vm336_vm8 = vweird.f32 %v449_v23  ;;  %v257_v40 = vld [vmem:[#allocation8] sm:$0x1] }
 0x171   :  { %v279_v6 = vadd.f32 %v445_v58, %v278_v2  ;;  %v300_v7 = vsub.f32 1.0, %v299_v3 }
 0x172   :  { %v333_v30 = vsub.f32 1.0, %v332_v29 }
 0x173   :  { %v283_v12 = vsel %vm282_vm1, %v445_v58, %v279_v6  ;;  %v301_v13 = vmul.f32 %v447_v62, %v300_v7 }
 0x174   :  { %v288_v16 = vsel %vm285_vm2, %v287_v8, %v283_v12  ;;  %v334_v15 = vmul.f32 %v449_v23, %v333_v30 }
 0x175   :  { %v289_v18 = vmul.f32 %v288_v16, %v272_v5  ;;  %v302_v19 = vadd.f32 %v447_v62, %v301_v13 }
 0x176   :  { %v335_v28 = vadd.f32 %v449_v23, %v334_v15 }
 0x177   :  { %v297_v21 = vmul.f32 %v296_v17, %v289_v18  ;;  %v306_v22 = vsel %vm305_vm5, %v447_v62, %v302_v19 }
 0x178   :  { %v311_v25 = vsel %vm308_vm6, %v310_v20, %v306_v22  ;;  %v337_v10 = vsel %vm336_vm8, %v449_v23, %v335_v28 }
 0x179   :  { %356 = vperm.xlu0 %430, %v297_v21   ;;  %v313_v26 = vmul.f32 %v311_v25, %v255_v24  ;;  %v312_v41 = vmul.f32 %v311_v25, %v256_v38  ;;  %v338_v45 = vmul.f32 %v337_v10, %v257_v40 }
 0x17b   :  { %v314_v27 = vadd.f32 1e-08, %v313_v26  ;;  %v341_v48 = vmul.f32 0.01, %v338_v45 }
 0x17d   :  { %450 = vrcp.f32 %v314_v27  ;;  %v326_v34 = vand.u32 2147483648, %v314_v27  ;;  %v324_v36 = vand.u32 2147483647, %v314_v27  ;;  %vm320_vm9 = vweird.f32 %v314_v27 }
 0x17f   :  { %v327_v39 = vor.u32 1.1754944e-38, %v326_v34  ;;  %vm325_vm11 = vcmp.eq.f32.partialorder %v324_v36, 8.507059e+37 }
 0x183   :  { %v451_v31 = vpop.eup %450 }
 0x184   :  { %v316_v32 = vmul.f32 %v451_v31, %v314_v27  ;;  %vm321_vm7 = vweird.f32 %v451_v31 }
 0x185   :  { %vm322_vm10 = vmor %vm320_vm9, %vm321_vm7 }
 0x186   :  { %v317_v33 = vsub.f32 1.0, %v316_v32 }
 0x188   :  { %v318_v35 = vmul.f32 %v451_v31, %v317_v33 }
 0x18a   :  { %v319_v37 = vadd.f32 %v451_v31, %v318_v35 }
 0x18c   :  { %v323_v42 = vsel %vm322_vm10, %v451_v31, %v319_v37 }
 0x18d   :  { %v328_v43 = vsel %vm325_vm11, %v327_v39, %v323_v42 }
 0x18e   :  { %v329_v44 = vmul.f32 %v328_v43, %v312_v41 }
 0x190   :  { %v330_v46 = vmul.f32 %v329_v44, %v296_v17 }
 0x192   :  { %365 = vperm.xlu1 %431, %v330_v46   ;;  %v339_v47 = vmul.f32 0.1, %v330_v46 }
 0x194   :  { %v340_v49 = vadd.f32 %v339_v47, %v297_v21 }
 0x196   :  { %v342_v50 = vadd.f32 %v341_v48, %v340_v49 }
 0x198   :  { %348 = vperm.xlu2 %429, %v342_v50  }
 0x1a0   :  { %374 = vperm.xlu2 %429, %v338_v45  }
 0x1eb   :  { %v357_v54 = vpop.permute.xlu0 %356 }
 0x1ec   :  { %v359_v56 = vperm.slane %v357_v54, 0 }
 0x1ee   :  { %v360_v60 = vsel %vm353_vm13, %v359_v56, 0.0 }
 0x1f2   :  { %v349_v51 = vpop.permute.xlu2 %348 }
 0x1f3   :  { %v351_v55 = vperm.slane %v349_v51, 0 }
 0x1f5   :  { %v352_v58 = vsel %vm345_vm12, %v351_v55, 0.0 }
 0x1f6   :  { %v361_v63 = vadd.f32 %v360_v60, %v352_v58 }
 0x1fa   :  { %v375_v57 = vpop.permute.xlu2 %374 }
 0x1fb   :  { %v377_v61 = vperm.slane %v375_v57, 0 }
 0x1fd   :  { %v378_v2 = vsel %vm371_vm15, %v377_v61, 0.0 }
 0x204   :  { %v366_v59 = vpop.permute.xlu1 %365 }
 0x205   :  { %v368_v62 = vperm.slane %v366_v59, 0 }
 0x207   :  { %v369_v0 = vsel %vm362_vm14, %v368_v62, 0.0 }
 0x208   :  { %v370_v1 = vadd.f32 %v369_v0, %v361_v63 }
 0x20a   :  { %v379_v3 = vadd.f32 %v378_v2, %v370_v1 }
 0x20c   :  { %380 = vst [vmem:[%s551_s2] sm:$0x1] %v379_v3 }

</bundles_post_ra>
